<compile_context>
chip_gen: v7x
topology: tpu7x:2x2x1
jax: 0.10.0
libtpu: 0.0.40
codegen_flags: <defaults>
</compile_context>

<pallas_src>
import jax
import jax.numpy as jnp
from jax import lax
from jax.experimental import pallas as pl
from jax.experimental.pallas import tpu as pltpu

# Deterministic "parameters" of the synthetic matcher / encoder.
POS_IOU_THR = 0.5
NEG_IOU_THR = 0.4
IG_IOF_THR = 0.5
INV_STD = (10.0, 10.0, 5.0, 5.0)   # 1 / (0.1, 0.1, 0.2, 0.2)
EPS = 1e-6


def _bbox_target_kernel(gt_num_ref, ig_num_ref,                 # scalar prefetch (SMEM)
                        boxes_ref, gt_ref, gt_t_ref, ig_ref,    # inputs (VMEM)
                        out_ref):                               # fused output (VMEM)
    b = pl.program_id(0)
    n_gt = gt_num_ref[b]
    n_ig = ig_num_ref[b]

    boxes = boxes_ref[0]          # (4, NT)  coords on sublanes, anchors on lanes
    gt = gt_ref[0]                # (M, 6)   [x1, y1, x2, y2, cls, extra] (zero-padded)
    gt_t = gt_t_ref[0]            # (6, M)   same data, MXU-friendly layout
    ig = ig_ref[0]                # (M2, 6)  ignore regions (zero-padded)
    nt = boxes.shape[1]

    ax1 = boxes[0:1, :]
    ay1 = boxes[1:2, :]
    ax2 = boxes[2:3, :]
    ay2 = boxes[3:4, :]
    aw0 = jnp.maximum(ax2 - ax1, 0.0)
    ah0 = jnp.maximum(ay2 - ay1, 0.0)
    area_a = aw0 * ah0                                            # (1, NT)

    gx1 = gt[:, 0:1]
    gy1 = gt[:, 1:2]
    gx2 = gt[:, 2:3]
    gy2 = gt[:, 3:4]
    area_g = jnp.maximum(gx2 - gx1, 0.0) * jnp.maximum(gy2 - gy1, 0.0)   # (M, 1)

    # ---- IoU hot path (M, NT): no exact divide ----------------------------
    iw = jnp.maximum(jnp.minimum(ax2, gx2) - jnp.maximum(ax1, gx1), 0.0)
    ih = jnp.maximum(jnp.minimum(ay2, gy2) - jnp.maximum(ay1, gy1), 0.0)
    inter = iw * ih
    union = area_a + area_g - inter + EPS                         # always > 0

    # Threshold decisions via multiply/subtract-compare (bit-exact vs
    # iou >= thr since sign(fl(a - b)) == sign(a - b)); reduced with float max.
    # Zero-padded gt rows give inter=0 and a positive union, so they can never
    # trip the thresholds -- no extra validity masking needed here.
    pos = jnp.max(inter - POS_IOU_THR * union, axis=0, keepdims=True) >= 0.0
    neg = jnp.max(inter - NEG_IOU_THR * union, axis=0, keepdims=True) < 0.0
    flag = jnp.where(pos, 1, jnp.where(neg, -1, 0)).astype(jnp.int32)   # (1, NT)

    # Ranking for the argmax gt only: approx reciprocal on the EUP slot.
    rank = inter * pl.reciprocal(union, approx=True)               # (M, NT)

    M = gt.shape[0]
    m_idx = lax.broadcasted_iota(jnp.int32, (M, 1), 0)              # (M, 1)
    valid = m_idx < n_gt
    max_rank = jnp.max(rank, axis=0, keepdims=True)                 # (1, NT)
    is_max = (rank == max_rank) & valid
    gt_id = jnp.min(jnp.where(is_max, m_idx, M), axis=0, keepdims=True)   # (1, NT)

    # ---- matched-gt gather as one MXU matmul (exact f32) -------------------
    onehot_f = (m_idx == gt_id).astype(jnp.float32)                 # (M, NT)
    matched = jnp.dot(gt_t, onehot_f,
                      preferred_element_type=jnp.float32)           # (6, NT)
    mx1 = matched[0:1, :]
    my1 = matched[1:2, :]
    mx2 = matched[2:3, :]
    my2 = matched[3:4, :]
    mcls = matched[4:5, :]

    # ---- RCNN delta encoding (exact divides: (1, NT) rows, off hot path) ---
    aw = jnp.maximum(aw0, EPS)
    ah = jnp.maximum(ah0, EPS)
    acx = ax1 + 0.5 * aw
    acy = ay1 + 0.5 * ah
    gw = jnp.maximum(mx2 - mx1, EPS)
    gh = jnp.maximum(my2 - my1, EPS)
    gcx = mx1 + 0.5 * gw
    gcy = my1 + 0.5 * gh

    dx = (gcx - acx) / aw * INV_STD[0]
    dy = (gcy - acy) / ah * INV_STD[1]
    dw = jnp.log(gw / aw) * INV_STD[2]
    dh = jnp.log(gh / ah) * INV_STD[3]

    zero = jnp.zeros_like(dx)
    reg_rows = jnp.concatenate(
        [jnp.where(pos, dx, zero), jnp.where(pos, dy, zero),
         jnp.where(pos, dw, zero), jnp.where(pos, dh, zero)], axis=0)   # (4, NT)

    # ---- ignore-region IoF: multiply-compare, in registers, runtime skip ---
    def _iof_hit():
        ix1 = ig[:, 0:1]
        iy1 = ig[:, 1:2]
        ix2 = ig[:, 2:3]
        iy2 = ig[:, 3:4]
        iiw = jnp.maximum(jnp.minimum(ax2, ix2) - jnp.maximum(ax1, ix1), 0.0)
        iih = jnp.maximum(jnp.minimum(ay2, iy2) - jnp.maximum(ay1, iy1), 0.0)
        t = jnp.max(iiw * iih - IG_IOF_THR * (area_a + EPS),
                    axis=0, keepdims=True)
        return (t > 0.0).astype(jnp.int32)

    ig_row = lax.cond(n_ig > 0, _iof_hit,
                      lambda: jnp.zeros((1, nt), jnp.int32))        # (1, NT)

    # ---- int rows [flag, gt_id, cls, ig_flag] ------------------------------
    gid_row = jnp.where(pos, gt_id, -1).astype(jnp.int32)
    cls = jnp.where(pos, mcls.astype(jnp.int32), 0)
    cls = jnp.where(flag == 0, -1, cls)
    cls = jnp.where(ig_row > 0, -1, cls).astype(jnp.int32)

    # Single full (8, NT) tile store: 4 int rows + 4 bitcast f32 reg rows.
    out_ref[0] = jnp.concatenate(
        [flag, gid_row, cls, ig_row, pltpu.bitcast(reg_rows, jnp.int32)],
        axis=0)


# ------------------------------ glue (plain JAX) ------------------------------

def _round_up(x, m):
    return ((x + m - 1) // m) * m


def reorganize_boxes(mlvl_anchors):
    """List of (B, A*4, H, W) -> (B, N, 4), matching _reorganize_boxes."""
    boxes = []
    for anchors in mlvl_anchors:
        bs = anchors.shape[0]
        boxes.append(jnp.transpose(anchors, (0, 2, 3, 1)).reshape(bs, -1, 4))
    return jnp.concatenate(boxes, axis=1)


def fill_with_max_len(tensor_lst):
    """List of (Ki, D) -> ((B, max(Ki), D), (B,)), matching _fill_with_max_len."""
    lens = [t.shape[0] for t in tensor_lst]
    max_len = max(lens)
    dtype = tensor_lst[0].dtype
    out = jnp.zeros((len(tensor_lst), max_len) + tensor_lst[0].shape[1:], dtype)
    for i, (t, l) in enumerate(zip(tensor_lst, lens)):
        out = out.at[i, :l].set(t)
    return out, jnp.asarray(lens, dtype)


def bbox_target_generator(boxes, gt_boxes, gt_boxes_num,
                          ig_regions, ig_regions_num, *, n_tile=None):
    """boxes: (B,N,4) f32, gt_boxes: (B,M,6) f32, ig_regions: (B,M2,6) f32."""
    B, N, _ = boxes.shape
    M = gt_boxes.shape[1]
    M2 = ig_regions.shape[1]

    gt_num = gt_boxes_num.reshape(-1).astype(jnp.int32)
    ig_num = ig_regions_num.reshape(-1).astype(jnp.int32)

    # Guarantee zero padding beyond the per-sample counts (the module spec
    # allows arbitrary padding); lets the kernel drop full (M, NT) masking.
    gt_valid = (jnp.arange(M)[None, :] < gt_num[:, None])[..., None]
    gt_boxes = jnp.where(gt_valid, gt_boxes.astype(jnp.float32), 0.0)
    ig_valid = (jnp.arange(M2)[None, :] < ig_num[:, None])[..., None]
    ig_regions = jnp.where(ig_valid, ig_regions.astype(jnp.float32), 0.0)

    # Anchor tile size keyed on M (per review): big tiles when M is small
    # (grid-step overhead bound), capped when M is large (vreg live range).
    if n_tile is None:
        n_tile = 4096 if M <= 16 else (512 if M >= 64 else 1024)
    nt = min(n_tile, _round_up(N, 128))
    n_pad = _round_up(N, nt)
    n_tiles = n_pad // nt

    boxes_t = jnp.transpose(boxes.astype(jnp.float32), (0, 2, 1))   # (B, 4, N)
    if n_pad != N:
        boxes_t = jnp.pad(boxes_t, ((0, 0), (0, 0), (0, n_pad - N)))
    gt_t = jnp.transpose(gt_boxes, (0, 2, 1))                       # (B, 6, M)

    grid_spec = pltpu.PrefetchScalarGridSpec(
        num_scalar_prefetch=2,
        grid=(B, n_tiles),
        in_specs=[
            pl.BlockSpec((1, 4, nt), lambda b, t, gtn, ign: (b, 0, t)),
            pl.BlockSpec((1, M, 6), lambda b, t, gtn, ign: (b, 0, 0)),
            pl.BlockSpec((1, 6, M), lambda b, t, gtn, ign: (b, 0, 0)),
            pl.BlockSpec((1, M2, 6), lambda b, t, gtn, ign: (b, 0, 0)),
        ],
        out_specs=pl.BlockSpec((1, 8, nt), lambda b, t, gtn, ign: (b, 0, t)),
    )
    fused = pl.pallas_call(
        _bbox_target_kernel,
        out_shape=jax.ShapeDtypeStruct((B, 8, n_pad), jnp.int32),
        grid_spec=grid_spec,
        compiler_params=pltpu.CompilerParams(
            dimension_semantics=("parallel", "parallel")),
    )(gt_num, ig_num, boxes_t, gt_boxes, gt_t, ig_regions)

    fused = fused[:, :, :N]
    int_out = fused[:, :4, :]                                        # (B, 4, N)
    reg_t = lax.bitcast_convert_type(fused[:, 4:, :], jnp.float32)   # (B, 4, N)

    labels = {
        "cls_label": int_out[:, 2, :],
        # reg_label in (B, N, 4) to match the reference label encoder layout.
        "reg_label": jnp.transpose(reg_t, (0, 2, 1)),
        "match_pos_flag": int_out[:, 0, :],
        "match_gt_id": int_out[:, 1, :],
        "ig_flag": int_out[:, 3, :],
    }
    return boxes, labels


# ------------------------------------ demo ------------------------------------

def _make_boxes(key, b, h, w, a, scale=64.0):
    """Build a valid (B, A*4, H, W) multi-level anchor tensor."""
    k1, k2 = jax.random.split(key)
    n = h * w * a
    xy = jax.random.uniform(k1, (b, n, 2), jnp.float32, 0.0, scale * 0.8)
    wh = jax.random.uniform(k2, (b, n, 2), jnp.float32, 4.0, scale * 0.3)
    boxes = jnp.concatenate([xy, xy + wh], axis=-1)              # (B, N, 4)
    # pack back into the NCHW anchor layout expected by _reorganize_boxes
    return jnp.transpose(boxes.reshape(b, h, w, a * 4), (0, 3, 1, 2))


def _make_gt(key, k, scale=64.0, num_classes=5):
    k1, k2, k3 = jax.random.split(key, 3)
    xy = jax.random.uniform(k1, (k, 2), jnp.float32, 0.0, scale * 0.7)
    wh = jax.random.uniform(k2, (k, 2), jnp.float32, 8.0, scale * 0.4)
    cls = jax.random.randint(k3, (k, 1), 1, num_classes + 1).astype(jnp.float32)
    extra = jnp.ones((k, 1), jnp.float32)
    return jnp.concatenate([xy, xy + wh, cls, extra], axis=-1)   # (K, 6)


if __name__ == "__main__":
    key = jax.random.PRNGKey(0)
    kb1, kb2, kg1, kg2, ki1, ki2 = jax.random.split(key, 6)

    B = 2
    # two anchor levels -> N = 8*8*2 + 4*4*8 = 256 boxes per sample
    mlvl_anchors = [
        _make_boxes(kb1, B, 8, 8, 2),     # (B, 8, 8, 8)
        _make_boxes(kb2, B, 4, 4, 8),     # (B, 32, 4, 4)
    ]
    boxes = reorganize_boxes(mlvl_anchors)           # (B, 256, 4)

    gt_list = [_make_gt(kg1, 3), _make_gt(kg2, 5)]   # ragged list of (Ki, 6)
    gt_boxes, gt_boxes_num = fill_with_max_len(gt_list)

    ig_list = [_make_gt(ki1, 2), _make_gt(ki2, 1)]
    ig_regions, ig_regions_num = fill_with_max_len(ig_list)

    out_boxes, labels = bbox_target_generator(
        boxes, gt_boxes, gt_boxes_num.flatten(),
        ig_regions, ig_regions_num.flatten())

    jax.block_until_ready((out_boxes, labels))
    assert out_boxes.shape == (B, 256, 4)
    assert labels["cls_label"].shape == (B, 256)
    assert labels["reg_label"].shape == (B, 256, 4)
    assert labels["match_pos_flag"].shape == (B, 256)
    assert labels["match_gt_id"].shape == (B, 256)
    assert labels["ig_flag"].shape == (B, 256)
    print("KERNEL_OK")
</pallas_src>

<mosaic_0001>
module attributes {stable_mosaic.version = 11 : i64} {
  func.func @_bbox_target_kernel(%arg0: i32, %arg1: i32, %arg2: memref<2xi32, #tpu.memory_space<smem>>, %arg3: memref<2xi32, #tpu.memory_space<smem>>, %arg4: memref<1x4x256xf32, #tpu.memory_space<vmem>>, %arg5: memref<1x5x6xf32, #tpu.memory_space<vmem>>, %arg6: memref<1x6x5xf32, #tpu.memory_space<vmem>>, %arg7: memref<1x2x6xf32, #tpu.memory_space<vmem>>, %arg8: memref<1x8x256xi32, #tpu.memory_space<vmem>>) attributes {dimension_semantics = [#tpu.dimension_semantics<parallel>, #tpu.dimension_semantics<parallel>], iteration_bounds = array<i64: 2, 1>, scalar_prefetch = 2 : i64, scratch_operands = 0 : i64, tpu.core_type = #tpu.core_type<tc>, window_params = [{transform_indices = @transform_0, window_bounds = array<i64: 1, 4, 256>}, {transform_indices = @transform_1, window_bounds = array<i64: 1, 5, 6>}, {transform_indices = @transform_2, window_bounds = array<i64: 1, 6, 5>}, {transform_indices = @transform_3, window_bounds = array<i64: 1, 2, 6>}, {transform_indices = @transform_4, window_bounds = array<i64: 1, 8, 256>}]} {
    %0 = arith.index_cast %arg0 : i32 to index
    %1 = memref.load %arg2[%0] : memref<2xi32, #tpu.memory_space<smem>>
    %2 = arith.index_cast %arg0 : i32 to index
    %3 = memref.load %arg3[%2] : memref<2xi32, #tpu.memory_space<smem>>
    %c0 = arith.constant 0 : index
    %c0_0 = arith.constant 0 : index
    %c0_1 = arith.constant 0 : index
    %4 = vector.load %arg4[%c0, %c0_0, %c0_1] : memref<1x4x256xf32, #tpu.memory_space<vmem>>, vector<1x4x256xf32>
    %5 = vector.shape_cast %4 : vector<1x4x256xf32> to vector<4x256xf32>
    %c0_2 = arith.constant 0 : index
    %c0_3 = arith.constant 0 : index
    %c0_4 = arith.constant 0 : index
    %6 = vector.load %arg5[%c0_2, %c0_3, %c0_4] : memref<1x5x6xf32, #tpu.memory_space<vmem>>, vector<1x5x6xf32>
    %7 = vector.shape_cast %6 : vector<1x5x6xf32> to vector<5x6xf32>
    %c0_5 = arith.constant 0 : index
    %c0_6 = arith.constant 0 : index
    %c0_7 = arith.constant 0 : index
    %8 = vector.load %arg6[%c0_5, %c0_6, %c0_7] : memref<1x6x5xf32, #tpu.memory_space<vmem>>, vector<1x6x5xf32>
    %9 = vector.shape_cast %8 : vector<1x6x5xf32> to vector<6x5xf32>
    %c0_8 = arith.constant 0 : index
    %c0_9 = arith.constant 0 : index
    %c0_10 = arith.constant 0 : index
    %10 = vector.load %arg7[%c0_8, %c0_9, %c0_10] : memref<1x2x6xf32, #tpu.memory_space<vmem>>, vector<1x2x6xf32>
    %11 = vector.shape_cast %10 : vector<1x2x6xf32> to vector<2x6xf32>
    %12 = vector.extract_strided_slice %5 {offsets = [0, 0], sizes = [1, 256], strides = [1, 1]} : vector<4x256xf32> to vector<1x256xf32>
    %13 = vector.extract_strided_slice %5 {offsets = [1, 0], sizes = [1, 256], strides = [1, 1]} : vector<4x256xf32> to vector<1x256xf32>
    %14 = vector.extract_strided_slice %5 {offsets = [2, 0], sizes = [1, 256], strides = [1, 1]} : vector<4x256xf32> to vector<1x256xf32>
    %15 = vector.extract_strided_slice %5 {offsets = [3, 0], sizes = [1, 256], strides = [1, 1]} : vector<4x256xf32> to vector<1x256xf32>
    %16 = arith.subf %14, %12 : vector<1x256xf32>
    %cst = arith.constant 0.000000e+00 : f32
    %17 = vector.broadcast %cst : f32 to vector<1x256xf32>
    %18 = arith.maximumf %16, %17 : vector<1x256xf32>
    %19 = arith.subf %15, %13 : vector<1x256xf32>
    %cst_11 = arith.constant 0.000000e+00 : f32
    %20 = vector.broadcast %cst_11 : f32 to vector<1x256xf32>
    %21 = arith.maximumf %19, %20 : vector<1x256xf32>
    %22 = arith.mulf %18, %21 : vector<1x256xf32>
    %23 = vector.extract_strided_slice %7 {offsets = [0, 0], sizes = [5, 1], strides = [1, 1]} : vector<5x6xf32> to vector<5x1xf32>
    %24 = vector.extract_strided_slice %7 {offsets = [0, 1], sizes = [5, 1], strides = [1, 1]} : vector<5x6xf32> to vector<5x1xf32>
    %25 = vector.extract_strided_slice %7 {offsets = [0, 2], sizes = [5, 1], strides = [1, 1]} : vector<5x6xf32> to vector<5x1xf32>
    %26 = vector.extract_strided_slice %7 {offsets = [0, 3], sizes = [5, 1], strides = [1, 1]} : vector<5x6xf32> to vector<5x1xf32>
    %27 = arith.subf %25, %23 : vector<5x1xf32>
    %cst_12 = arith.constant 0.000000e+00 : f32
    %28 = vector.broadcast %cst_12 : f32 to vector<5x1xf32>
    %29 = arith.maximumf %27, %28 : vector<5x1xf32>
    %30 = arith.subf %26, %24 : vector<5x1xf32>
    %cst_13 = arith.constant 0.000000e+00 : f32
    %31 = vector.broadcast %cst_13 : f32 to vector<5x1xf32>
    %32 = arith.maximumf %30, %31 : vector<5x1xf32>
    %33 = arith.mulf %29, %32 : vector<5x1xf32>
    %34 = vector.broadcast %14 : vector<1x256xf32> to vector<5x256xf32>
    %35 = vector.broadcast %25 : vector<5x1xf32> to vector<5x256xf32>
    %36 = arith.minimumf %34, %35 : vector<5x256xf32>
    %37 = vector.broadcast %12 : vector<1x256xf32> to vector<5x256xf32>
    %38 = vector.broadcast %23 : vector<5x1xf32> to vector<5x256xf32>
    %39 = arith.maximumf %37, %38 : vector<5x256xf32>
    %40 = arith.subf %36, %39 : vector<5x256xf32>
    %cst_14 = arith.constant 0.000000e+00 : f32
    %41 = vector.broadcast %cst_14 : f32 to vector<5x256xf32>
    %42 = arith.maximumf %40, %41 : vector<5x256xf32>
    %43 = vector.broadcast %15 : vector<1x256xf32> to vector<5x256xf32>
    %44 = vector.broadcast %26 : vector<5x1xf32> to vector<5x256xf32>
    %45 = arith.minimumf %43, %44 : vector<5x256xf32>
    %46 = vector.broadcast %13 : vector<1x256xf32> to vector<5x256xf32>
    %47 = vector.broadcast %24 : vector<5x1xf32> to vector<5x256xf32>
    %48 = arith.maximumf %46, %47 : vector<5x256xf32>
    %49 = arith.subf %45, %48 : vector<5x256xf32>
    %cst_15 = arith.constant 0.000000e+00 : f32
    %50 = vector.broadcast %cst_15 : f32 to vector<5x256xf32>
    %51 = arith.maximumf %49, %50 : vector<5x256xf32>
    %52 = arith.mulf %42, %51 : vector<5x256xf32>
    %53 = vector.broadcast %22 : vector<1x256xf32> to vector<5x256xf32>
    %54 = vector.broadcast %33 : vector<5x1xf32> to vector<5x256xf32>
    %55 = arith.addf %53, %54 : vector<5x256xf32>
    %56 = arith.subf %55, %52 : vector<5x256xf32>
    %cst_16 = arith.constant 9.99999997E-7 : f32
    %57 = vector.broadcast %cst_16 : f32 to vector<5x256xf32>
    %58 = arith.addf %56, %57 : vector<5x256xf32>
    %cst_17 = arith.constant 5.000000e-01 : f32
    %59 = vector.broadcast %cst_17 : f32 to vector<5x256xf32>
    %60 = arith.mulf %59, %58 : vector<5x256xf32>
    %61 = arith.subf %52, %60 : vector<5x256xf32>
    %cst_18 = arith.constant dense<0xFF800000> : vector<256xf32>
    %62 = vector.multi_reduction <maximumf>, %61, %cst_18 [0] : vector<5x256xf32> to vector<256xf32>
    %63 = vector.shape_cast %62 : vector<256xf32> to vector<1x256xf32>
    %cst_19 = arith.constant 0.000000e+00 : f32
    %64 = vector.broadcast %cst_19 : f32 to vector<1x256xf32>
    %65 = arith.cmpf oge, %63, %64 : vector<1x256xf32>
    %cst_20 = arith.constant 4.000000e-01 : f32
    %66 = vector.broadcast %cst_20 : f32 to vector<5x256xf32>
    %67 = arith.mulf %66, %58 : vector<5x256xf32>
    %68 = arith.subf %52, %67 : vector<5x256xf32>
    %cst_21 = arith.constant dense<0xFF800000> : vector<256xf32>
    %69 = vector.multi_reduction <maximumf>, %68, %cst_21 [0] : vector<5x256xf32> to vector<256xf32>
    %70 = vector.shape_cast %69 : vector<256xf32> to vector<1x256xf32>
    %cst_22 = arith.constant 0.000000e+00 : f32
    %71 = vector.broadcast %cst_22 : f32 to vector<1x256xf32>
    %72 = arith.cmpf olt, %70, %71 : vector<1x256xf32>
    %c-1_i32 = arith.constant -1 : i32
    %c0_i32 = arith.constant 0 : i32
    %73 = vector.broadcast %c-1_i32 : i32 to vector<1x256xi32>
    %74 = vector.broadcast %c0_i32 : i32 to vector<1x256xi32>
    %75 = arith.select %72, %73, %74 : vector<1x256xi1>, vector<1x256xi32>
    %c1_i32 = arith.constant 1 : i32
    %76 = vector.broadcast %c1_i32 : i32 to vector<1x256xi32>
    %77 = arith.select %65, %76, %75 : vector<1x256xi1>, vector<1x256xi32>
    %78 = tpu.reciprocal %58 {approx = true} : vector<5x256xf32> -> vector<5x256xf32>
    %79 = arith.mulf %52, %78 : vector<5x256xf32>
    %80 = tpu.iota {dimensions = array<i32: 0>} : vector<5x1xi32>
    %81 = vector.broadcast %1 : i32 to vector<5x1xi32>
    %82 = arith.cmpi slt, %80, %81 : vector<5x1xi32>
    %cst_23 = arith.constant dense<0xFF800000> : vector<256xf32>
    %83 = vector.multi_reduction <maximumf>, %79, %cst_23 [0] : vector<5x256xf32> to vector<256xf32>
    %84 = vector.shape_cast %83 : vector<256xf32> to vector<1x256xf32>
    %85 = vector.broadcast %84 : vector<1x256xf32> to vector<5x256xf32>
    %86 = arith.cmpf oeq, %79, %85 : vector<5x256xf32>
    %87 = vector.broadcast %82 : vector<5x1xi1> to vector<5x256xi1>
    %88 = arith.andi %86, %87 : vector<5x256xi1>
    %c5_i32 = arith.constant 5 : i32
    %89 = vector.shape_cast %80 : vector<5x1xi32> to vector<5x1xi32>
    %90 = vector.broadcast %89 : vector<5x1xi32> to vector<5x256xi32>
    %91 = vector.broadcast %c5_i32 : i32 to vector<5x256xi32>
    %92 = arith.select %88, %90, %91 : vector<5x256xi1>, vector<5x256xi32>
    %cst_24 = arith.constant dense<2147483647> : vector<256xi32>
    %93 = vector.multi_reduction <minsi>, %92, %cst_24 [0] : vector<5x256xi32> to vector<256xi32>
    %94 = vector.shape_cast %93 : vector<256xi32> to vector<1x256xi32>
    %95 = vector.broadcast %80 : vector<5x1xi32> to vector<5x256xi32>
    %96 = vector.broadcast %94 : vector<1x256xi32> to vector<5x256xi32>
    %97 = arith.cmpi eq, %95, %96 : vector<5x256xi32>
    %98 = arith.extui %97 : vector<5x256xi1> to vector<5x256xi32>
    %99 = arith.sitofp %98 : vector<5x256xi32> to vector<5x256xf32>
    %cst_25 = arith.constant dense<0.000000e+00> : vector<6x256xf32>
    %100 = tpu.matmul %9, %99, %cst_25 {dimension_numbers = #tpu.dot_dimension_numbers<[1], [0], [0], [1], [0, 0, 1, 1], [], []>} : vector<6x5xf32>, vector<5x256xf32>, vector<6x256xf32> -> vector<6x256xf32>
    %101 = vector.extract_strided_slice %100 {offsets = [0, 0], sizes = [1, 256], strides = [1, 1]} : vector<6x256xf32> to vector<1x256xf32>
    %102 = vector.extract_strided_slice %100 {offsets = [1, 0], sizes = [1, 256], strides = [1, 1]} : vector<6x256xf32> to vector<1x256xf32>
    %103 = vector.extract_strided_slice %100 {offsets = [2, 0], sizes = [1, 256], strides = [1, 1]} : vector<6x256xf32> to vector<1x256xf32>
    %104 = vector.extract_strided_slice %100 {offsets = [3, 0], sizes = [1, 256], strides = [1, 1]} : vector<6x256xf32> to vector<1x256xf32>
    %105 = vector.extract_strided_slice %100 {offsets = [4, 0], sizes = [1, 256], strides = [1, 1]} : vector<6x256xf32> to vector<1x256xf32>
    %cst_26 = arith.constant 9.99999997E-7 : f32
    %106 = vector.broadcast %cst_26 : f32 to vector<1x256xf32>
    %107 = arith.maximumf %18, %106 : vector<1x256xf32>
    %cst_27 = arith.constant 9.99999997E-7 : f32
    %108 = vector.broadcast %cst_27 : f32 to vector<1x256xf32>
    %109 = arith.maximumf %21, %108 : vector<1x256xf32>
    %cst_28 = arith.constant 5.000000e-01 : f32
    %110 = vector.broadcast %cst_28 : f32 to vector<1x256xf32>
    %111 = arith.mulf %110, %107 : vector<1x256xf32>
    %112 = arith.addf %12, %111 : vector<1x256xf32>
    %cst_29 = arith.constant 5.000000e-01 : f32
    %113 = vector.broadcast %cst_29 : f32 to vector<1x256xf32>
    %114 = arith.mulf %113, %109 : vector<1x256xf32>
    %115 = arith.addf %13, %114 : vector<1x256xf32>
    %116 = arith.subf %103, %101 : vector<1x256xf32>
    %cst_30 = arith.constant 9.99999997E-7 : f32
    %117 = vector.broadcast %cst_30 : f32 to vector<1x256xf32>
    %118 = arith.maximumf %116, %117 : vector<1x256xf32>
    %119 = arith.subf %104, %102 : vector<1x256xf32>
    %cst_31 = arith.constant 9.99999997E-7 : f32
    %120 = vector.broadcast %cst_31 : f32 to vector<1x256xf32>
    %121 = arith.maximumf %119, %120 : vector<1x256xf32>
    %cst_32 = arith.constant 5.000000e-01 : f32
    %122 = vector.broadcast %cst_32 : f32 to vector<1x256xf32>
    %123 = arith.mulf %122, %118 : vector<1x256xf32>
    %124 = arith.addf %101, %123 : vector<1x256xf32>
    %cst_33 = arith.constant 5.000000e-01 : f32
    %125 = vector.broadcast %cst_33 : f32 to vector<1x256xf32>
    %126 = arith.mulf %125, %121 : vector<1x256xf32>
    %127 = arith.addf %102, %126 : vector<1x256xf32>
    %128 = arith.subf %124, %112 : vector<1x256xf32>
    %129 = arith.divf %128, %107 : vector<1x256xf32>
    %cst_34 = arith.constant 1.000000e+01 : f32
    %130 = vector.broadcast %cst_34 : f32 to vector<1x256xf32>
    %131 = arith.mulf %129, %130 : vector<1x256xf32>
    %132 = arith.subf %127, %115 : vector<1x256xf32>
    %133 = arith.divf %132, %109 : vector<1x256xf32>
    %cst_35 = arith.constant 1.000000e+01 : f32
    %134 = vector.broadcast %cst_35 : f32 to vector<1x256xf32>
    %135 = arith.mulf %133, %134 : vector<1x256xf32>
    %136 = arith.divf %118, %107 : vector<1x256xf32>
    %137 = math.log %136 : vector<1x256xf32>
    %cst_36 = arith.constant 5.000000e+00 : f32
    %138 = vector.broadcast %cst_36 : f32 to vector<1x256xf32>
    %139 = arith.mulf %137, %138 : vector<1x256xf32>
    %140 = arith.divf %121, %109 : vector<1x256xf32>
    %141 = math.log %140 : vector<1x256xf32>
    %cst_37 = arith.constant 5.000000e+00 : f32
    %142 = vector.broadcast %cst_37 : f32 to vector<1x256xf32>
    %143 = arith.mulf %141, %142 : vector<1x256xf32>
    %cst_38 = arith.constant 0.000000e+00 : f32
    %144 = vector.broadcast %cst_38 : f32 to vector<1x256xf32>
    %145 = arith.select %65, %131, %144 : vector<1x256xi1>, vector<1x256xf32>
    %146 = arith.select %65, %135, %144 : vector<1x256xi1>, vector<1x256xf32>
    %147 = arith.select %65, %139, %144 : vector<1x256xi1>, vector<1x256xf32>
    %148 = arith.select %65, %143, %144 : vector<1x256xi1>, vector<1x256xf32>
    %149 = tpu.concatenate %145, %146, %147, %148 in 0 : vector<1x256xf32>, vector<1x256xf32>, vector<1x256xf32>, vector<1x256xf32> -> vector<4x256xf32>
    %c0_i32_39 = arith.constant 0 : i32
    %150 = arith.cmpi sgt, %3, %c0_i32_39 : i32
    %151 = arith.extui %150 : i1 to i32
    %c0_i32_40 = arith.constant 0 : i32
    %152 = arith.cmpi ne, %151, %c0_i32_40 : i32
    %153 = scf.if %152 -> (vector<1x256xi32>) {
      %172 = vector.extract_strided_slice %11 {offsets = [0, 0], sizes = [2, 1], strides = [1, 1]} : vector<2x6xf32> to vector<2x1xf32>
      %173 = vector.extract_strided_slice %11 {offsets = [0, 1], sizes = [2, 1], strides = [1, 1]} : vector<2x6xf32> to vector<2x1xf32>
      %174 = vector.extract_strided_slice %11 {offsets = [0, 2], sizes = [2, 1], strides = [1, 1]} : vector<2x6xf32> to vector<2x1xf32>
      %175 = vector.extract_strided_slice %11 {offsets = [0, 3], sizes = [2, 1], strides = [1, 1]} : vector<2x6xf32> to vector<2x1xf32>
      %176 = vector.broadcast %14 : vector<1x256xf32> to vector<2x256xf32>
      %177 = vector.broadcast %174 : vector<2x1xf32> to vector<2x256xf32>
      %178 = arith.minimumf %176, %177 : vector<2x256xf32>
      %179 = vector.broadcast %12 : vector<1x256xf32> to vector<2x256xf32>
      %180 = vector.broadcast %172 : vector<2x1xf32> to vector<2x256xf32>
      %181 = arith.maximumf %179, %180 : vector<2x256xf32>
      %182 = arith.subf %178, %181 : vector<2x256xf32>
      %cst_50 = arith.constant 0.000000e+00 : f32
      %183 = vector.broadcast %cst_50 : f32 to vector<2x256xf32>
      %184 = arith.maximumf %182, %183 : vector<2x256xf32>
      %185 = vector.broadcast %15 : vector<1x256xf32> to vector<2x256xf32>
      %186 = vector.broadcast %175 : vector<2x1xf32> to vector<2x256xf32>
      %187 = arith.minimumf %185, %186 : vector<2x256xf32>
      %188 = vector.broadcast %13 : vector<1x256xf32> to vector<2x256xf32>
      %189 = vector.broadcast %173 : vector<2x1xf32> to vector<2x256xf32>
      %190 = arith.maximumf %188, %189 : vector<2x256xf32>
      %191 = arith.subf %187, %190 : vector<2x256xf32>
      %cst_51 = arith.constant 0.000000e+00 : f32
      %192 = vector.broadcast %cst_51 : f32 to vector<2x256xf32>
      %193 = arith.maximumf %191, %192 : vector<2x256xf32>
      %194 = arith.mulf %184, %193 : vector<2x256xf32>
      %cst_52 = arith.constant 9.99999997E-7 : f32
      %195 = vector.broadcast %cst_52 : f32 to vector<1x256xf32>
      %196 = arith.addf %22, %195 : vector<1x256xf32>
      %cst_53 = arith.constant 5.000000e-01 : f32
      %197 = vector.broadcast %cst_53 : f32 to vector<1x256xf32>
      %198 = arith.mulf %197, %196 : vector<1x256xf32>
      %199 = vector.broadcast %198 : vector<1x256xf32> to vector<2x256xf32>
      %200 = arith.subf %194, %199 : vector<2x256xf32>
      %cst_54 = arith.constant dense<0xFF800000> : vector<256xf32>
      %201 = vector.multi_reduction <maximumf>, %200, %cst_54 [0] : vector<2x256xf32> to vector<256xf32>
      %202 = vector.shape_cast %201 : vector<256xf32> to vector<1x256xf32>
      %cst_55 = arith.constant 0.000000e+00 : f32
      %203 = vector.broadcast %cst_55 : f32 to vector<1x256xf32>
      %204 = arith.cmpf ogt, %202, %203 : vector<1x256xf32>
      %205 = arith.extui %204 : vector<1x256xi1> to vector<1x256xi32>
      scf.yield %205 : vector<1x256xi32>
    } else {
      %c0_i32_50 = arith.constant 0 : i32
      %172 = vector.broadcast %c0_i32_50 : i32 to vector<1x256xi32>
      scf.yield %172 : vector<1x256xi32>
    }
    %c-1_i32_41 = arith.constant -1 : i32
    %154 = vector.broadcast %c-1_i32_41 : i32 to vector<1x256xi32>
    %155 = arith.select %65, %94, %154 : vector<1x256xi1>, vector<1x256xi32>
    %156 = arith.fptosi %105 : vector<1x256xf32> to vector<1x256xi32>
    %c0_i32_42 = arith.constant 0 : i32
    %157 = vector.broadcast %c0_i32_42 : i32 to vector<1x256xi32>
    %158 = arith.select %65, %156, %157 : vector<1x256xi1>, vector<1x256xi32>
    %c0_i32_43 = arith.constant 0 : i32
    %159 = vector.broadcast %c0_i32_43 : i32 to vector<1x256xi32>
    %160 = arith.cmpi eq, %77, %159 : vector<1x256xi32>
    %c-1_i32_44 = arith.constant -1 : i32
    %161 = vector.broadcast %c-1_i32_44 : i32 to vector<1x256xi32>
    %162 = arith.select %160, %161, %158 : vector<1x256xi1>, vector<1x256xi32>
    %c0_i32_45 = arith.constant 0 : i32
    %163 = vector.broadcast %c0_i32_45 : i32 to vector<1x256xi32>
    %164 = arith.cmpi sgt, %153, %163 : vector<1x256xi32>
    %c-1_i32_46 = arith.constant -1 : i32
    %165 = vector.broadcast %c-1_i32_46 : i32 to vector<1x256xi32>
    %166 = arith.select %164, %165, %162 : vector<1x256xi1>, vector<1x256xi32>
    %167 = tpu.bitcast %149 : vector<4x256xf32> -> vector<4x256xi32>
    %168 = tpu.concatenate %77, %155, %166, %153, %167 in 0 : vector<1x256xi32>, vector<1x256xi32>, vector<1x256xi32>, vector<1x256xi32>, vector<4x256xi32> -> vector<8x256xi32>
    %c0_47 = arith.constant 0 : index
    %c0_48 = arith.constant 0 : index
    %c0_49 = arith.constant 0 : index
    %169 = vector.load %arg8[%c0_47, %c0_48, %c0_49] : memref<1x8x256xi32, #tpu.memory_space<vmem>>, vector<1x8x256xi32>
    %170 = vector.shape_cast %169 : vector<1x8x256xi32> to vector<8x256xi32>
    %171 = vector.shape_cast %168 : vector<8x256xi32> to vector<1x8x256xi32>
    tpu.vector_store %arg8[%c0_47, %c0_48, %c0_49], %171 {strides = array<i32>} : memref<1x8x256xi32, #tpu.memory_space<vmem>>, vector<1x8x256xi32>,
    return
  }
  func.func @transform_0(%arg0: i32, %arg1: i32, %arg2: memref<2xi32, #tpu.memory_space<smem>>, %arg3: memref<2xi32, #tpu.memory_space<smem>>) -> (i32, i32, i32) {
    %c0_i32 = arith.constant 0 : i32
    %c0_i32_0 = arith.constant 0 : i32
    return %arg0, %c0_i32, %arg1 : i32, i32, i32
  }
  func.func @transform_1(%arg0: i32, %arg1: i32, %arg2: memref<2xi32, #tpu.memory_space<smem>>, %arg3: memref<2xi32, #tpu.memory_space<smem>>) -> (i32, i32, i32) {
    %c0_i32 = arith.constant 0 : i32
    %c0_i32_0 = arith.constant 0 : i32
    %c0_i32_1 = arith.constant 0 : i32
    return %arg0, %c0_i32, %c0_i32_0 : i32, i32, i32
  }
  func.func @transform_2(%arg0: i32, %arg1: i32, %arg2: memref<2xi32, #tpu.memory_space<smem>>, %arg3: memref<2xi32, #tpu.memory_space<smem>>) -> (i32, i32, i32) {
    %c0_i32 = arith.constant 0 : i32
    %c0_i32_0 = arith.constant 0 : i32
    %c0_i32_1 = arith.constant 0 : i32
    return %arg0, %c0_i32, %c0_i32_0 : i32, i32, i32
  }
  func.func @transform_3(%arg0: i32, %arg1: i32, %arg2: memref<2xi32, #tpu.memory_space<smem>>, %arg3: memref<2xi32, #tpu.memory_space<smem>>) -> (i32, i32, i32) {
    %c0_i32 = arith.constant 0 : i32
    %c0_i32_0 = arith.constant 0 : i32
    %c0_i32_1 = arith.constant 0 : i32
    return %arg0, %c0_i32, %c0_i32_0 : i32, i32, i32
  }
  func.func @transform_4(%arg0: i32, %arg1: i32, %arg2: memref<2xi32, #tpu.memory_space<smem>>, %arg3: memref<2xi32, #tpu.memory_space<smem>>) -> (i32, i32, i32) {
    %c0_i32 = arith.constant 0 : i32
    %c0_i32_0 = arith.constant 0 : i32
    return %arg0, %c0_i32, %arg1 : i32, i32, i32
  }
}

</mosaic_0001>

<bundles_post_ra>
// kernel: tpu_custom_call.1
= control target key start
LH: loop header
LB: loop body
LE: loop exit
PB: predicated region body
PF: predicated region fallthrough
CT: control target
= control target key end

     0   :  { %s1711_s0 = inlined_call_operand.vmem [shape: s32[2], index: 0, kind: input, shape index: {}]   ;;  %s1712_s2 = inlined_call_operand.vmem [shape: f32[2,4,256], index: 2, kind: input, shape index: {}]   ;;  %s1713_s3 = inlined_call_operand.vmem [shape: f32[2,5,6], index: 3, kind: input, shape index: {}]   ;;  %s1714_s4 = inlined_call_operand.vmem [shape: f32[2,6,5], index: 4, kind: input, shape index: {}]   ;;  %s1715_s5 = inlined_call_operand.vmem [shape: f32[2,2,6], index: 5, kind: input, shape index: {}]   ;;  %s1716_s6 = inlined_call_operand.hbm [shape: s32[2,8,256], index: 6, kind: output, shape index: {}]   ;;  %s1717_s1 = inlined_call_operand.vmem [shape: s32[2], index: 1, kind: input, shape index: {}]  }
   0x1   :  { %s11_s23 = sshll.u32 %s1711_s0, 4  ;;  %s15_s26 = sshll.u32 %s1717_s1, 4  ;;  %s12_s23 = int_to_ptr.vmem [resolvable:$true] %s11_s23  ;;  %s16_s26 = int_to_ptr.vmem [resolvable:$true] %s15_s26 }
   0x2   :  { %s1155_s27 = scalar_lea.vmem %s12_s23, 16  ;;  %p1160_p1 = scmp.lt.s32.totalorder %s12_s23, %s12_s23 }
   0x3   :  { %p1156_p0 = scmp.ne.s32.totalorder %s12_s23, %s1155_s27  ;;  %p1161_p2 = scmp.lt.s32.totalorder %s1155_s27, %s1155_s27 }
   0x5   :  { %p1162_p3 = por %p1161_p2, %p1160_p1 }
   0x7   :  { %p1163_p4 = pnand %p1162_p3, %p1156_p0 }
   0x9   :  { %1166 = shalt.err (!%p1163_p4)  }
   0xa   :  { %s1277_s28 = smov [#allocation3]   ;;  %s1167_s29 = scalar_lea.vmem %s16_s26, 16 }
   0xb   :  { %14 = dma.vmem_to_smem %s12_s23, 16, %s1277_s28, [#allocation2] }
   0xc   :  { %p1168_p5 = scmp.ne.s32.totalorder %s16_s26, %s1167_s29  ;;  %p1172_p6 = scmp.lt.s32.totalorder %s16_s26, %s16_s26 }
   0xd   :  { %p1173_p7 = scmp.lt.s32.totalorder %s1167_s29, %s1167_s29 }
   0xf   :  { %p1174_p8 = por %p1173_p7, %p1172_p6 }
  0x11   :  { %p1175_p9 = pnand %p1174_p8, %p1168_p5 }
  0x13   :  { %1178 = shalt.err (!%p1175_p9)  }
  0x14   :  { %s1278_s0 = smov [#allocation4]  }
  0x15   :  { %18 = dma.vmem_to_smem %s16_s26, 16, %s1278_s0, [#allocation2] }
  0x16   :  { %1239 = dma.done.wait [#allocation2], 32 }
  0x17   :  { %1240 = vsyncadd [#allocation2], 4294967264 }
  0x18   :  { %20 = sfence }
  0x19   :  { %21 = vsyncpa [#allocation6], 0 }
  0x1a   :  { %23 = vsyncpa [#allocation6 + $0x1], 0  ;;  %s1332_s1 = smov 0   ;;  %s1334_s30 = smov 0  }
  0x1b   :  { %s1336_s7 = smov 0   ;;  %s1338_s8 = smov 0  }
  0x1c   :  { %s1340_s9 = smov 0   ;;  %s1342_s10 = smov 0  }
  0x1d LB: > { %s1000_s11 = sadd.s32 4294967295, %s1267_s10   ;;  %s1001_s12 = sadd.s32 4294967294, %s1267_s10   ;;  %s1267_s10 = sphi %s1342_s10, %s29_s10   ;;  %s1263_s9 = sphi %s1340_s9, %s1724_s9   ;;  %s1259_s8 = sphi %s1338_s8, %s1723_s8   ;;  %s1255_s7 = sphi %s1336_s7, %s1722_s7   ;;  %s1251_s30 = sphi %s1334_s30, %s1721_s30   ;;  %s1247_s1 = sphi %s1332_s1, %s1720_s1  }
  0x1e   : > { %s41_s13 = sadd.s32 1, %s1263_s9  ;;  %s156_s14 = sadd.s32 1, %s1255_s7 }
  0x1f   : > { %p43_p10 = scmp.ge.s32.totalorder %s41_s13, 2  ;;  %p166_p11 = scmp.ne.s32.totalorder %s1255_s7, %s1251_s30 }
  0x20   : > { %p167_p12 = scmp.eq.s32.totalorder %s1000_s11, 1  ;;  %p172_p13 = scmp.ne.s32.totalorder %s1251_s30, %s1247_s1 }
  0x21   : > { %s1726_s13 = smov (%p43_p10, %s41_s13), 0  ;;  %p173_p1 = scmp.eq.s32.totalorder %s1001_s12, 1 }
  0x22   : > { %p1372_p0 = por %p167_p12, %p166_p11  ;;  %s151_s16 = ssub.s32 %s1263_s9, %s1726_s13 }
  0x23   : > { %p1004_p2 = scmp.ge.s32.totalorder %s1267_s10, 1  ;;  %p154_p3 = scmp.eq.s32.totalorder %s151_s16, 0 }
  0x24   : > { %p1379_p4 = por %p173_p1, %p172_p13  ;;  %p225_p5 = scmp.lt.s32.totalorder %s1267_s10, 3 }
  0x25   : > { %s1385_s18 = scalar_select %p154_p3, %s1255_s7, %s156_s14  }
  0x26   : > { %p226_p6 = pnand %p1004_p2, %p225_p5 }
  0x27   : > { %p268_p7 = scmp.lt.s32.totalorder (!%p226_p6), %s1259_s8, 1  ;;  %v1279_v0 = vmov (!%p226_p6), 2   ;;  %v1280_v1 = vmov (!%p226_p6), 3   ;;  %s1281_s28 = smov (!%p226_p6), 2   ;;  %v1282_v4 = vmov (!%p226_p6), 0   ;;  %v1283_v5 = vmov (!%p226_p6), 1  }
  0x28   : > { %229 = sbr.rel (%p226_p6) target bundleno = 883 (0x373), region = 36  ;;  %1124 = vset.pattern.permute.xlu1 (!%p226_p6), %v1279_v0  ;;  %1126 = vset.pattern.permute.xlu0 (!%p226_p6), %v1280_v1  ;;  %s1284_s29 = smov (!%p226_p6), 127   ;;  %v1285_v11 = vmov (!%p226_p6), 0.0   ;;  %v317_v12 = vlaneseq (!%p226_p6)  ;;  %vm457_vm0 = vcmask (!%p226_p6), 1044480  }
  0x29   : > { %s264_s0 = sand.u32 (!%p226_p6), 1, %s1251_s30   ;;  %s1407_s12 = sld [smem:[#allocation4 + %s1259_s8]] (!%p226_p6)  ;;  %628 = vmatprep.mubr.f32.mxu0 (!%p226_p6), %v1285_v11 }
  0x2a   : > { %s1404_s11 = sshll.u32 (!%p226_p6), %s264_s0, 4  ;;  %v1414_v13 = vshrl.u32 (!%p226_p6), %v317_v12, 7 }
  0x2c   : > { %v1420_v17 = vsub.s32 (!%p226_p6), 2, %v1414_v13  ;;  %v1423_v18 = vsub.s32 (!%p226_p6), 6, %v1414_v13  ;;  %v1426_v19 = vsub.s32 (!%p226_p6), 0, %v1414_v13  ;;  %v347_v20 = vsub.s32 (!%p226_p6), 4, %v1414_v13 }
  0x2d   : > { %v1430_v21 = vsub.s32 (!%p226_p6), 1, %v1414_v13  ;;  %v399_v22 = vsub.s32 (!%p226_p6), 5, %v1414_v13  ;;  %v1434_v23 = vsub.s32 (!%p226_p6), 3, %v1414_v13  ;;  %v375_v24 = vsub.s32 (!%p226_p6), 7, %v1414_v13 }
  0x2f   : > { %s269_s19 = scalar_select %p268_p7, %s1259_s8, 1 }
  0x30   : > { %p1018_p8 = scmp.le.s32.totalorder %s1407_s12, 0 }
  0x31   : > { %s1389_s20 = sshll.u32 %s269_s19, 3  ;;  %s1010_s21 = sshll.u32 %s269_s19, 1 }
  0x32   : > { %s280_s24 = scalar_lea.vmem %s1713_s3, %s1389_s20  ;;  %s288_s27 = scalar_lea.vmem %s1715_s5, %s1010_s21 }
  0x33   : > { %v293_v2 = vld [vmem:[%s280_s24] sm:$0x1f]  ;;  %s275_s19 = scalar_lea.vmem %s1712_s2, %s1389_s20  ;;  %s290_s21 = sld [smem:[#allocation3 + %s1259_s8]] }
  0x34   : > { %v1398_v3 = vld [vmem:[%s288_s27] sm:$0x3]  ;;  %307 = vrot.lane.b32.xlu0 %v293_v2, %s1281_s28  ;;  %336 = vperm.xlu1 %1124, %v293_v2   ;;  %s284_s24 = scalar_lea.vmem %s1714_s4, %s1389_s20  ;;  %s1595_s20 = scalar_lea.vmem [#allocation5], %s1404_s11 }
  0x35   : > { %v1416_v14 = vld [vmem:[%s275_s19] sm:$0xff] }
  0x36   : > { %v297_v16 = vrot.slane %v1416_v14, 6  ;;  %v320_v26 = vrot.slane %v1416_v14, %v1420_v17  ;;  %v324_v28 = vrot.slane %v1416_v14, %v1423_v18  ;;  %v344_v29 = vrot.slane %v1416_v14, %v1426_v19 }
  0x37   : > { %v348_v30 = vrot.slane %v1416_v14, %v347_v20  ;;  %v396_v31 = vrot.slane %v1416_v14, %v1430_v21  ;;  %v400_v32 = vrot.slane %v1416_v14, %v399_v22  ;;  %v372_v34 = vrot.slane %v1416_v14, %v1434_v23 }
  0x38   : > { %1125 = vset.pattern.permute.xlu1 %v1282_v4  ;;  %v299_v25 = vsub.f32 %v1416_v14, %v297_v16  ;;  %v376_v35 = vrot.slane %v1416_v14, %v375_v24  ;;  %v1460_v36 = vrot.slane %v320_v26, %v1420_v17  ;;  %v1463_v37 = vrot.slane %v324_v28, %v1420_v17 }
  0x39   : > { %360 = vperm.xlu1 %1125, %v293_v2   ;;  %v1466_v38 = vrot.slane %v344_v29, %v1426_v19  ;;  %v1469_v39 = vrot.slane %v348_v30, %v1426_v19  ;;  %v1472_v40 = vrot.slane %v396_v31, %v1430_v21  ;;  %v1475_v42 = vrot.slane %v400_v32, %v1430_v21 }
  0x3a   : > { %v1452_v33 = vmax.f32 %v299_v25, 0.0  ;;  %v1478_v43 = vrot.slane %v372_v34, %v1434_v23  ;;  %v1481_v44 = vrot.slane %v376_v35, %v1434_v23 }
  0x3c   : > { %v1011_v45 = vrot.slane %v1452_v33, 9 }
  0x3d   : > { %1127 = vset.pattern.permute.xlu1 %v1283_v5 }
  0x3e   : > { %412 = vperm.xlu1 %1127, %v293_v2   ;;  %v1493_v55 = vmul.f32 %v1011_v45, %v1452_v33 }
  0x40   : > { %v427_v60 = vrot.slane %v1493_v55, %v1420_v17  ;;  %v431_v61 = vrot.slane %v1493_v55, %v1423_v18 }
  0x42   : > { %1128 = vset.pattern.permute.xlu1 %v1279_v0  ;;  %v441_v5 = vrot.slane %v431_v61, %v1420_v17 }
  0xa6   : > { %v308_v6 = vpop.permute.xlu0 %307 }
  0xa7   : > { %v310_v7 = vsub.f32 %v293_v2, %v308_v6 }
  0xa9   : > { %v311_v8 = vmax.f32 %v310_v7, 0.0 }
  0xab   : > { %313 = vrot.lane.b32.xlu0 %v311_v8, %s1284_s29 }
  0xaf   : > { %388 = vperm.xlu0 %1126, %v293_v2   ;;  %v437_v2 = vrot.slane %v427_v60, %v1420_v17 }
  0xb3   : > { %1129 = vset.pattern.permute.xlu0 %v1279_v0  ;;  %v337_v15 = vpop.permute.xlu1 %336 }
  0xb4   : > { %v339_v47 = vmin.f32 %v1460_v36, %v337_v15  ;;  %v340_v48 = vmin.f32 %v1463_v37, %v337_v15 }
  0xb8   : > { %v361_v27 = vpop.permute.xlu1 %360 }
  0xb9   : > { %v363_v49 = vmax.f32 %v1466_v38, %v361_v27  ;;  %v364_v50 = vmax.f32 %v1469_v39, %v361_v27 }
  0xbb   : > { %v365_v56 = vsub.f32 %v339_v47, %v363_v49  ;;  %v366_v57 = vsub.f32 %v340_v48, %v364_v50 }
  0xbd   : > { %v413_v41 = vpop.permute.xlu1 %412  ;;  %v367_v62 = vmax.f32 %v365_v56, 0.0  ;;  %v368_v63 = vmax.f32 %v366_v57, 0.0 }
  0xbe   : > { %v415_v51 = vmax.f32 %v1472_v40, %v413_v41  ;;  %v416_v52 = vmax.f32 %v1475_v42, %v413_v41 }
 0x11d   : > { %v314_v9 = vpop.permute.xlu0 %313 }
 0x11e   : > { %v316_v10 = vmul.f32 %v314_v9, %v311_v8 }
 0x120   : > { %444 = vperm.xlu1 %1128, %v316_v10  }
 0x12e   : > { %v389_v46 = vpop.permute.xlu0 %388 }
 0x12f   : > { %v391_v53 = vmin.f32 %v1478_v43, %v389_v46  ;;  %v392_v54 = vmin.f32 %v1481_v44, %v389_v46 }
 0x131   : > { %v417_v58 = vsub.f32 %v391_v53, %v415_v51  ;;  %v418_v59 = vsub.f32 %v392_v54, %v416_v52 }
 0x133   : > { %v419_v0 = vmax.f32 %v417_v58, 0.0  ;;  %v420_v1 = vmax.f32 %v418_v59, 0.0 }
 0x135   : > { %v421_v7 = vmul.f32 %v419_v0, %v367_v62  ;;  %v422_v8 = vmul.f32 %v420_v1, %v368_v63 }
 0x19f   : > { %v445_v6 = vpop.permute.xlu1 %444 }
 0x1a0   : > { %v447_v9 = vadd.f32 %v445_v6, %v437_v2  ;;  %v448_v10 = vadd.f32 %v445_v6, %v441_v5 }
 0x1a2   : > { %v449_v12 = vsub.f32 %v447_v9, %v421_v7  ;;  %v450_v15 = vsub.f32 %v448_v10, %v422_v8 }
 0x1a4   : > { %v451_v16 = vadd.f32 1e-06, %v449_v12  ;;  %v452_v25 = vadd.f32 1e-06, %v450_v15 }
 0x1a6   : > { %v453_v26 = vmul.f32 0.5, %v451_v16  ;;  %v454_v27 = vmul.f32 0.5, %v452_v25  ;;  %v474_v28 = vmul.f32 0.4, %v451_v16  ;;  %v475_v29 = vmul.f32 0.4, %v452_v25 }
 0x1a7   : > { %1130 = vrcp.f32 %v451_v16 }
 0x1a8   : > { %v455_v30 = vsub.f32 %v421_v7, %v453_v26  ;;  %v456_v31 = vsub.f32 %v422_v8, %v454_v27  ;;  %v476_v32 = vsub.f32 %v421_v7, %v474_v28  ;;  %v477_v34 = vsub.f32 %v422_v8, %v475_v29 }
 0x1a9   : > { %1132 = vrcp.f32 %v452_v25 }
 0x1aa   : > { %v458_v35 = vsel %vm457_vm0, %v455_v30, -inf  ;;  %v465_v41 = vsel %vm457_vm0, %v456_v31, -inf  ;;  %v478_v45 = vsel %vm457_vm0, %v476_v32, -inf  ;;  %v485_v46 = vsel %vm457_vm0, %v477_v34, -inf }
 0x1ab   : > { %v459_v47 = vrot.slane %v458_v35, 4  ;;  %v466_v48 = vrot.slane %v465_v41, 4  ;;  %v479_v49 = vrot.slane %v478_v45, 4  ;;  %v486_v50 = vrot.slane %v485_v46, 4 }
 0x1ad   : > { %v460_v51 = vmax.f32 %v458_v35, %v459_v47  ;;  %v467_v52 = vmax.f32 %v465_v41, %v466_v48  ;;  %v480_v53 = vmax.f32 %v478_v45, %v479_v49  ;;  %v487_v54 = vmax.f32 %v485_v46, %v486_v50 }
 0x1ae   : > { %v504_v47 = vstv %s290_s21 }
 0x1af   : > { %v461_v56 = vrot.slane %v460_v51, 2  ;;  %v468_v57 = vrot.slane %v467_v52, 2  ;;  %v481_v58 = vrot.slane %v480_v53, 2  ;;  %v488_v59 = vrot.slane %v487_v54, 2 }
 0x1b0   : > { %vm505_vm5 = vcmp.lt.s32.totalorder %v1414_v13, %v504_v47 }
 0x1b1   : > { %v1131_v60 = vpop.eup %1130  ;;  %v462_v61 = vmax.f32 %v460_v51, %v461_v56  ;;  %v469_v62 = vmax.f32 %v467_v52, %v468_v57  ;;  %v482_v63 = vmax.f32 %v480_v53, %v481_v58  ;;  %v489_v0 = vmax.f32 %v487_v54, %v488_v59 }
 0x1b2   : > { %v500_v1 = vmul.f32 %v1131_v60, %v421_v7 }
 0x1b3   : > { %v1133_v2 = vpop.eup %1132  ;;  %v463_v5 = vrot.slane %v462_v61, 1  ;;  %v470_v6 = vrot.slane %v469_v62, 1  ;;  %v483_v9 = vrot.slane %v482_v63, 1  ;;  %v490_v10 = vrot.slane %v489_v0, 1 }
 0x1b4   : > { %v501_v12 = vmul.f32 %v1133_v2, %v422_v8  ;;  %v506_v15 = vsel %vm457_vm0, %v500_v1, -inf }
 0x1b5   : > { %v1507_v16 = vmax.f32 %v462_v61, %v463_v5  ;;  %v484_v25 = vmax.f32 %v482_v63, %v483_v9  ;;  %v491_v26 = vmax.f32 %v489_v0, %v490_v10  ;;  %v507_v27 = vrot.slane %v506_v15, 4 }
 0x1b6   : > { %v513_v28 = vsel %vm457_vm0, %v501_v12, -inf  ;;  %v1510_v29 = vmax.f32 %v469_v62, %v470_v6 }
 0x1b7   : > { %vm492_vm1 = vcmp.lt.f32.partialorder %v484_v25, 0.0  ;;  %vm493_vm2 = vcmp.lt.f32.partialorder %v491_v26, 0.0  ;;  %v514_v7 = vrot.slane %v513_v28, 4  ;;  %v508_v30 = vmax.f32 %v506_v15, %v507_v27 }
 0x1b8   : > { %v494_v31 = vsel %vm492_vm1, 4294967295, %v1282_v4  ;;  %v495_v32 = vsel %vm493_vm2, 4294967295, %v1282_v4  ;;  %vm472_vm3 = vcmp.ge.f32.partialorder %v1507_v16, 0.0  ;;  %vm473_vm4 = vcmp.ge.f32.partialorder %v1510_v29, 0.0 }
 0x1b9   : > { %v515_v8 = vmax.f32 %v513_v28, %v514_v7  ;;  %v509_v34 = vrot.slane %v508_v30, 2  ;;  %v1518_v35 = vsel %vm472_vm3, 1, %v494_v31  ;;  %v1522_v41 = vsel %vm473_vm4, 1, %v495_v32 }
 0x1ba   : > { %v635_v15 = vmax.f32 %v1452_v33, 1e-06 }
 0x1bb   : > { %v516_v45 = vrot.slane %v515_v8, 2  ;;  %v510_v46 = vmax.f32 %v508_v30, %v509_v34 }
 0x1bc   : > { %v711_v25 = vrot.slane %v635_v15, %v375_v24  ;;  %v679_v26 = vrot.slane %v635_v15, %v1420_v17  ;;  %v707_v27 = vrot.slane %v635_v15, %v1434_v23  ;;  %v683_v28 = vrot.slane %v635_v15, %v1423_v18 }
 0x1bd   : > { %v517_v48 = vmax.f32 %v515_v8, %v516_v45  ;;  %v511_v49 = vrot.slane %v510_v46, 1 }
 0x1be   : > { %1134 = vrcp.f32 %v711_v25 }
 0x1bf   : > { %v518_v4 = vrot.slane %v517_v48, 1  ;;  %v512_v50 = vmax.f32 %v510_v46, %v511_v49  ;;  %1136 = vrcp.f32 %v679_v26 }
 0x1c0   : > { %1138 = vrcp.f32 %v707_v27 }
 0x1c1   : > { %v519_v51 = vmax.f32 %v517_v48, %v518_v4  ;;  %vm520_vm6 = vcmp.eq.f32.partialorder %v500_v1, %v512_v50  ;;  %1140 = vrcp.f32 %v683_v28 }
 0x1c2   : > { %vm524_vm7 = vmand %vm520_vm6, %vm505_vm5  ;;  %vm747_vm6 = vcmask 1041408  }
 0x1c3   : > { %vm521_vm8 = vcmp.eq.f32.partialorder %v501_v12, %v519_v51  ;;  %v526_v52 = vsel %vm524_vm7, %v1414_v13, 5  ;;  %v294_v12 = vld [vmem:[%s284_s24] sm:$0x3f]  ;;  %vm750_vm7 = vcmask 1042432  }
 0x1c4   : > { %vm525_vm9 = vmand %vm521_vm8, %vm505_vm5  ;;  %v528_v53 = vsel %vm457_vm0, %v526_v52, 2147483647  ;;  %vm554_vm5 = vcmask 39936  }
 0x1c5   : > { %v527_v54 = vsel %vm525_vm9, %v1414_v13, 5  ;;  %v529_v56 = vrot.slane %v528_v53, 4 }
 0x1c6   : > { %v538_v57 = vsel %vm457_vm0, %v527_v54, 2147483647 }
 0x1c7   : > { %v539_v58 = vrot.slane %v538_v57, 4  ;;  %vm530_vm10 = vcmp.lt.s32.totalorder %v528_v53, %v529_v56 }
 0x1c8   : > { %v531_v59 = vsel %vm530_vm10, %v528_v53, %v529_v56  ;;  %v1135_v32 = vpop.eup %1134 }
 0x1c9   : > { %vm540_vm11 = vcmp.lt.s32.totalorder %v538_v57, %v539_v58  ;;  %v532_v60 = vrot.slane %v531_v59, 2  ;;  %v1137_v8 = vpop.eup %1136 }
 0x1ca   : > { %v541_v61 = vsel %vm540_vm11, %v538_v57, %v539_v58  ;;  %v1139_v34 = vpop.eup %1138 }
 0x1cb   : > { %v542_v62 = vrot.slane %v541_v61, 2  ;;  %vm533_vm12 = vcmp.lt.s32.totalorder %v531_v59, %v532_v60  ;;  %v1141_v46 = vpop.eup %1140 }
 0x1cc   : > { %v534_v63 = vsel %vm533_vm12, %v531_v59, %v532_v60 }
 0x1cd   : > { %vm543_vm13 = vcmp.lt.s32.totalorder %v541_v61, %v542_v62  ;;  %v535_v0 = vrot.slane %v534_v63, 1 }
 0x1ce   : > { %v544_v1 = vsel %vm543_vm13, %v541_v61, %v542_v62 }
 0x1cf   : > { %v545_v2 = vrot.slane %v544_v1, 1  ;;  %vm536_vm14 = vcmp.lt.s32.totalorder %v534_v63, %v535_v0 }
 0x1d0   : > { %v1529_v5 = vsel %vm536_vm14, %v534_v63, %v535_v0 }
 0x1d1   : > { %vm546_vm15 = vcmp.lt.s32.totalorder %v544_v1, %v545_v2  ;;  %vm548_vm1 = vcmp.eq.s32.totalorder %v1414_v13, %v1529_v5 }
 0x1d2   : > { %v1537_v6 = vsel %vm546_vm15, %v544_v1, %v545_v2  ;;  %v1012_v9 = vsel %vm548_vm1, 1.0, %v1285_v11 }
 0x1d3   : > { %vm549_vm2 = vcmp.eq.s32.totalorder %v1414_v13, %v1537_v6 }
 0x1d4   : > { %v1013_v10 = vsel %vm549_vm2, 1.0, %v1285_v11  ;;  %v636_v11 = vmul.f32 0.5, %v635_v15 }
 0x1d5   : > { %1014 = vmatprep.subr.msk.mxu0 %vm457_vm0, %v1013_v10 }
 0x1d6   : > { %1015 = vmatpush1.msk.msra.mxu0 %vm457_vm0, %v1012_v9  ;;  %v1017_v30 = vrot.slane %v636_v11, 10  ;;  %vm744_vm0 = vcmask 1040384  }
 0x1d7   : > { %1016 = vmatmul.mubr.msk.f32.vlgmr.msra.gmra.mrb[0].mxu0 %vm554_vm5, %v294_v12 }
 0x1d8   : > { %v641_v47 = vadd.f32 %v1017_v30, %v1416_v14 }
 0x1da   : > { %v666_v57 = vrot.slane %v641_v47, %v1426_v19  ;;  %v695_v58 = vrot.slane %v641_v47, %v1430_v21  ;;  %v670_v60 = vrot.slane %v641_v47, %v347_v20  ;;  %v699_v14 = vrot.slane %v641_v47, %v399_v22 }
 0x2aa   : > { %v1551_v7 = vpop.f32.mrb[0].mxu0 }
 0x2ab   : > { %v644_v31 = vrot.slane %v1551_v7, 6  ;;  %v1554_v33 = vpop.f32.mrb[1].mxu0 }
 0x2ac   : > { %v645_v24 = vrot.slane %v1554_v33, 6 }
 0x2ad   : > { %v648_v23 = vsub.f32 %v1551_v7, %v644_v31 }
 0x2ae   : > { %v649_v45 = vsub.f32 %v1554_v33, %v645_v24 }
 0x2af   : > { %v650_v48 = vmax.f32 %v648_v23, 1e-06 }
 0x2b0   : > { %v651_v49 = vmax.f32 %v649_v45, 1e-06 }
 0x2b1   : > { %v652_v4 = vmul.f32 0.5, %v650_v48  ;;  %v720_v50 = vmul.f32 %v1137_v8, %v650_v48  ;;  %v728_v51 = vmul.f32 %v1139_v34, %v650_v48 }
 0x2b2   : > { %v653_v52 = vmul.f32 0.5, %v651_v49  ;;  %v721_v53 = vmul.f32 %v1141_v46, %v651_v49  ;;  %v729_v54 = vmul.f32 %v1135_v32, %v651_v49 }
 0x2b3   : > { %v656_v56 = vrot.slane %v652_v4, 2  ;;  %1142 = vlog2.f32 %v720_v50 }
 0x2b4   : > { %1144 = vlog2.f32 %v728_v51  ;;  %v657_v59 = vrot.slane %v653_v52, 2 }
 0x2b5   : > { %v660_v61 = vadd.f32 %v656_v56, %v1551_v7  ;;  %1146 = vlog2.f32 %v721_v53 }
 0x2b6   : > { %v661_v62 = vadd.f32 %v657_v59, %v1554_v33  ;;  %1148 = vlog2.f32 %v729_v54  ;;  %v1600_v59 = vmov 0  }
 0x2b7   : > { %v673_v63 = vsub.f32 %v660_v61, %v666_v57  ;;  %v702_v0 = vsub.f32 %v660_v61, %v695_v58  ;;  %v1598_v58 = vmov 0   ;;  %v1288_v61 = vmov (!%p1018_p8), 1  }
 0x2b8   : > { %v674_v19 = vsub.f32 %v661_v62, %v670_v60  ;;  %v703_v1 = vsub.f32 %v661_v62, %v699_v14  ;;  %v1286_v60 = vmov (!%p1018_p8), 3   ;;  %v1287_v14 = vmov (!%p1018_p8), 2  }
 0x2b9   : > { %v687_v21 = vmul.f32 %v1137_v8, %v673_v63  ;;  %v715_v2 = vmul.f32 %v1139_v34, %v702_v0  ;;  %1152 = vset.pattern.permute.xlu1 (!%p1018_p8), %v1286_v60  ;;  %1150 = vset.pattern.permute.xlu0 (!%p1018_p8), %v1287_v14  ;;  %v1289_v62 = vmov (!%p1018_p8), 0   ;;  %v792_v63 = vadd.f32 (!%p1018_p8), 1e-06, %v1493_v55 }
 0x2ba   : > { %v689_v9 = vmul.f32 %v1141_v46, %v674_v19  ;;  %v717_v10 = vmul.f32 %v1135_v32, %v703_v1  ;;  %775 = vperm.xlu1 (!%p1018_p8), %1152, %v1398_v3   ;;  %759 = vperm.xlu0 (!%p1018_p8), %1150, %v1398_v3  }
 0x2bb   : > { %v690_v12 = vmul.f32 10.0, %v687_v21  ;;  %v718_v15 = vmul.f32 10.0, %v715_v2  ;;  %v793_v1 = vmul.f32 (!%p1018_p8), 0.5, %v792_v63 }
 0x2bc   : > { %v691_v20 = vmul.f32 10.0, %v689_v9  ;;  %v719_v13 = vmul.f32 10.0, %v717_v10 }
 0x2bd   : > { %v1143_v22 = vpop.eup %1142  ;;  %v736_v25 = vsel %vm472_vm3, %v690_v12, 0.0  ;;  %v738_v26 = vsel %vm472_vm3, %v718_v15, 0.0  ;;  %v798_v21 = vrot.slane (!%p1018_p8), %v793_v1, %v1420_v17  ;;  %v802_v2 = vrot.slane (!%p1018_p8), %v793_v1, %v1423_v18 }
 0x2be   : > { %v1145_v27 = vpop.eup %1144  ;;  %v723_v28 = vmul.f32 0.6931472, %v1143_v22  ;;  %v745_v11 = vsel %vm744_vm0, %v736_v25, %v738_v26  ;;  %v737_v30 = vsel %vm473_vm4, %v691_v20, 0.0  ;;  %v739_v31 = vsel %vm473_vm4, %v719_v13, 0.0  ;;  %1153 = vset.pattern.permute.xlu1 (!%p1018_p8), %v1288_v61  ;;  %1151 = vset.pattern.permute.xlu0 (!%p1018_p8), %v1289_v62 }
 0x2bf   : > { %v1147_v32 = vpop.eup %1146  ;;  %v731_v24 = vmul.f32 0.6931472, %v1145_v27  ;;  %v746_v8 = vsel %vm744_vm0, %v737_v30, %v739_v31  ;;  %781 = vperm.xlu1 (!%p1018_p8), %1153, %v1398_v3   ;;  %765 = vperm.xlu0 (!%p1018_p8), %1151, %v1398_v3  }
 0x2c0   : > { %v1149_v23 = vpop.eup %1148  ;;  %v726_v34 = vmul.f32 5.0, %v723_v28  ;;  %v725_v45 = vmul.f32 0.6931472, %v1147_v32  ;;  %756 = sbr.rel (%p1018_p8) target bundleno = 856 (0x358), region = 40 }
 0x2c1   : > { %v734_v46 = vmul.f32 5.0, %v731_v24  ;;  %v733_v47 = vmul.f32 0.6931472, %v1149_v23 }
 0x2c2   : > { %v740_v48 = vsel %vm472_vm3, %v726_v34, 0.0  ;;  %v727_v49 = vmul.f32 5.0, %v725_v45 }
 0x2c3   : > { %v742_v4 = vsel %vm472_vm3, %v734_v46, 0.0  ;;  %v748_v50 = vsel %vm747_vm6, %v745_v11, %v740_v48  ;;  %v735_v51 = vmul.f32 5.0, %v733_v47  ;;  %1154 = vset.pattern.permute.xlu0 (!%p1018_p8), %v1288_v61 }
 0x2c4   : > { %v1584_v52 = vsel %vm750_vm7, %v748_v50, %v742_v4  ;;  %v741_v53 = vsel %vm473_vm4, %v727_v49, 0.0 }
 0x2c5   : > { %v743_v54 = vsel %vm473_vm4, %v735_v51, 0.0  ;;  %v749_v56 = vsel %vm747_vm6, %v746_v8, %v741_v53 }
 0x2c6   : > { %v1592_v57 = vsel %vm750_vm7, %v749_v56, %v743_v54 }
 0x339   : > { %v776_v0 = vpop.permute.xlu1 %775  ;;  %v760_v19 = vpop.permute.xlu0 %759 }
 0x33a   : > { %v778_v9 = vmin.f32 %v1478_v43, %v776_v0  ;;  %v779_v10 = vmin.f32 %v1481_v44, %v776_v0  ;;  %v762_v12 = vmin.f32 %v1460_v36, %v760_v19  ;;  %v763_v15 = vmin.f32 %v1463_v37, %v760_v19 }
 0x33b   : > { %v808_v44 = vrot.slane %v798_v21, %v1420_v17  ;;  %v812_v36 = vrot.slane %v802_v2, %v1420_v17 }
 0x33e   : > { %v782_v20 = vpop.permute.xlu1 %781  ;;  %v766_v3 = vpop.permute.xlu0 %765 }
 0x33f   : > { %v784_v13 = vmax.f32 %v1472_v40, %v782_v20  ;;  %v785_v55 = vmax.f32 %v1475_v42, %v782_v20  ;;  %v768_v22 = vmax.f32 %v1466_v38, %v766_v3  ;;  %v769_v25 = vmax.f32 %v1469_v39, %v766_v3 }
 0x341   : > { %v786_v26 = vsub.f32 %v778_v9, %v784_v13  ;;  %v787_v18 = vsub.f32 %v779_v10, %v785_v55  ;;  %v770_v27 = vsub.f32 %v762_v12, %v768_v22  ;;  %v771_v43 = vsub.f32 %v763_v15, %v769_v25 }
 0x343   : > { %v788_v28 = vmax.f32 %v786_v26, 0.0  ;;  %v789_v37 = vmax.f32 %v787_v18, 0.0  ;;  %v772_v11 = vmax.f32 %v770_v27, 0.0  ;;  %v773_v30 = vmax.f32 %v771_v43, 0.0 }
 0x345   : > { %v790_v31 = vmul.f32 %v788_v28, %v772_v11  ;;  %v791_v40 = vmul.f32 %v789_v37, %v773_v30 }
 0x347   : > { %v813_v32 = vsub.f32 %v790_v31, %v808_v44  ;;  %v814_v42 = vsub.f32 %v791_v40, %v812_v36 }
 0x349   : > { %v815_v38 = vsel %vm747_vm6, %v813_v32, -inf  ;;  %v822_v39 = vsel %vm747_vm6, %v814_v42, -inf }
 0x34a   : > { %v816_v24 = vrot.slane %v815_v38, 4  ;;  %v823_v8 = vrot.slane %v822_v39, 4 }
 0x34c   : > { %v817_v23 = vmax.f32 %v815_v38, %v816_v24  ;;  %v824_v34 = vmax.f32 %v822_v39, %v823_v8 }
 0x34e   : > { %v818_v45 = vrot.slane %v817_v23, 2  ;;  %v825_v46 = vrot.slane %v824_v34, 2 }
 0x350   : > { %v819_v47 = vmax.f32 %v817_v23, %v818_v45  ;;  %v826_v17 = vmax.f32 %v824_v34, %v825_v46 }
 0x352   : > { %v820_v48 = vrot.slane %v819_v47, 1  ;;  %v827_v49 = vrot.slane %v826_v17, 1 }
 0x354   : > { %v821_v4 = vmax.f32 %v819_v47, %v820_v48  ;;  %v828_v50 = vmax.f32 %v826_v17, %v827_v49 }
 0x356   : > { %vm829_vm8 = vcmp.gt.f32.partialorder %v821_v4, 0.0  ;;  %vm830_vm9 = vcmp.gt.f32.partialorder %v828_v50, 0.0 }
 0x357   : > { %v831_v59 = vsel %vm829_vm8, 1, %v1289_v62   ;;  %v832_v58 = vsel %vm830_vm9, 1, %v1289_v62  }
 0x358 PF: > { %s1031_s25 = scalar_select %p1018_p8, 1, 0  ;;  %v1026_v51 = vtrunc.f32 %v1551_v7  ;;  %v1028_v53 = vtrunc.f32 %v1554_v33  ;;  %vm846_vm10 = vcmp.eq.s32.totalorder %v1518_v35, 0  ;;  %v840_v60 = vsel %vm472_vm3, %v1529_v5, 4294967295  ;;  %v1275_v59 = vphi %v1600_v59, %v831_v59   ;;  %v1271_v58 = vphi %v1598_v58, %v832_v58  }
 0x359   : > { %vm847_vm12 = vcmp.eq.s32.totalorder %v1522_v41, 0  ;;  %v841_v7 = vsel %vm473_vm4, %v1537_v6, 4294967295  ;;  %v859_v29 = vrot.slane %v1592_v57, 4  ;;  %s1025_s26 = sshll.u32 %s1259_s8, 8  ;;  %s888_s27 = sshll.u32 %s1595_s20, 4  ;;  %s1662_s27 = int_to_ptr.vmem [resolvable:$true] %s888_s27 }
 0x35a   : > { %v1032_v54 = vstv %s1031_s25  ;;  %v1027_v56 = vcvt.f32.s32 %v1026_v51  ;;  %v1029_v14 = vcvt.f32.s32 %v1028_v53  ;;  %v861_v6 = vsel %vm744_vm0, %v1522_v41, %v841_v7  ;;  %s1660_s11 = scalar_lea.hbm %s1716_s6, %s1025_s26  ;;  %s872_s8 = scalar_lea.sflag [#allocation6], %s264_s0 }
 0x35b   : > { %vm1033_vm11 = vcmp.ne.s32.totalorder %v1032_v54, 0  ;;  %s1179_s12 = scalar_lea.vmem %s1662_s27, 256  ;;  %s1290_s14 = smov [#allocation5]  }
 0x35c   : > { %v1034_v61 = vsel %vm1033_vm11, 0, %v1275_v59  ;;  %v844_v62 = vsel %vm472_vm3, %v1027_v56, 0  ;;  %v1038_v63 = vsel %vm1033_vm11, 0, %v1271_v58  ;;  %v845_v0 = vsel %vm473_vm4, %v1029_v14, 0  ;;  %p1180_p9 = scmp.ne.s32.totalorder %s1662_s27, %s1179_s12  ;;  %s1183_s16 = sshll.u32 %s1290_s14, 4  ;;  %s1184_s16 = int_to_ptr.vmem [resolvable:$false] %s1183_s16 }
 0x35d   : > { %v848_v33 = vsel %vm846_vm10, 4294967295, %v844_v62  ;;  %vm850_vm13 = vcmp.gt.s32.totalorder %v1034_v61, 0  ;;  %vm851_vm14 = vcmp.gt.s32.totalorder %v1038_v63, 0  ;;  %v860_v59 = vsel %vm744_vm0, %v1518_v35, %v840_v60  ;;  %s1185_s19 = scalar_lea.vmem %s1184_s16, 512  ;;  %p1186_p12 = scmp.lt.s32.totalorder %s1662_s27, %s1184_s16 }
 0x35e   : > { %v852_v5 = vsel %vm850_vm13, 4294967295, %v848_v33  ;;  %v849_v19 = vsel %vm847_vm12, 4294967295, %v845_v0  ;;  %v858_v58 = vrot.slane %v1584_v52, 4  ;;  %vm866_vm3 = vcmask 1043456   ;;  %p1181_p10 = pnand %p1180_p9, %p1372_p0  ;;  %p1187_p13 = scmp.lt.s32.totalorder %s1185_s19, %s1179_s12 }
 0x35f   : > { %v856_v16 = vrot.slane %v852_v5, 2  ;;  %v853_v1 = vsel %vm851_vm14, 4294967295, %v849_v19 }
 0x360   : > { %v857_v21 = vrot.slane %v853_v1, 2  ;;  %p1182_p11 = pneg %p1181_p10  ;;  %p1188_p1 = por %p1187_p13, %p1186_p12 }
 0x361   : > { %v862_v35 = vsel %vm747_vm6, %v860_v59, %v856_v16 }
 0x362   : > { %v864_v2 = vsel %vm750_vm7, %v862_v35, %v1034_v61  ;;  %v863_v9 = vsel %vm747_vm6, %v861_v6, %v857_v21  ;;  %p1189_p2 = pnand %p1188_p1, %p1182_p11 }
 0x363   : > { %v867_v52 = vsel %vm866_vm3, %v864_v2, %v858_v58  ;;  %v865_v10 = vsel %vm750_vm7, %v863_v9, %v1038_v63 }
 0x364   : > { %869 = vst [vmem:[%s1595_s20] sm:$0xff] %v867_v52  ;;  %v868_v41 = vsel %vm866_vm3, %v865_v10, %v859_v29 }
 0x365   : > { %870 = vst [vmem:[%s1595_s20 + $0x8] sm:$0xff] %v868_v41 }
 0x366   : > { %1192 = shalt.err (!%p1189_p2)
}
 0x367   : > { %s1193_s0 = scalar_lea.hbm %s1660_s11, 256  ;;  %s1197_s23 = scalar_lea.hbm %s1716_s6, 512 }
 0x368   : > { %p1194_p3 = scmp.ne.s32.totalorder %s1660_s11, %s1193_s0  ;;  %p1198_p7 = scmp.lt.u32.totalorder %s1660_s11, %s1716_s6 }
 0x369   : > { %p1199_p8 = scmp.lt.u32.totalorder %s1197_s23, %s1193_s0  ;;  %p1201_p10 = scmp.lt.u32.totalorder %s1193_s0, %s1660_s11 }
 0x36a   : > { %p1195_p5 = pnand %p1194_p3, %p1372_p0 }
 0x36b   : > { %p1200_p9 = por %p1199_p8, %p1198_p7 }
 0x36c   : > { %p1196_p6 = pneg %p1195_p5 }
 0x36d   : > { %p1202_p11 = por %p1201_p10, %p1200_p9 }
 0x36f   : > { %p1203_p12 = pnand %p1202_p11, %p1196_p6 }
 0x371   : > { %1206 = shalt.err (!%p1203_p12)
}
 0x372   : > { %1039 = dma.vmem_to_hbm [thread:$0]  (%p1372_p0), %s1662_s27, 256, %s1660_s11, %s872_s8  }
 0x373 PF: > { %p1046_p13 = scmp.ge.s32.totalorder %s1267_s10, 2  ;;  %s900_s25 = sand.u32 1, %s1247_s1  }
 0x374   : > { %s901_s26 = scalar_lea.sflag [#allocation6], %s900_s25 }
 0x375   : > { %p1042_p1 = pnand %p1046_p13, %p1379_p4 }
 0x377   : > { %1242 = dma.done.wait (!%p1042_p1), %s901_s26, 256  }
 0x378   : > { %1244 = vsyncadd (!%p1042_p1), %s901_s26, 4294967040  ;;  %s29_s10 = sadd.s32 1, %s1267_s10   ;;  %s1720_s1 = smov %s1251_s30 }
 0x379   : > { %p26_p2 = scmp.ge.s32.totalorder %s29_s10, 4   ;;  %s1721_s30 = smov %s1255_s7 }
 0x37a   : > { %s1722_s7 = smov %s1385_s18  ;;  %s1723_s8 = smov %s1263_s9 }
 0x37b   : > { %s1724_s9 = smov %s1726_s13  ;;  %28 = sbr.rel (!%p26_p2) target bundleno = 29 (0x1d), region = 88 }
 0x382   :  { %906 = vsyncpa [#allocation6], 1 }
 0x383   :  { %908 = vsyncpa [#allocation6 + $0x1], 1 }

</bundles_post_ra>
